<compile_context>
chip_gen: v7x
topology: tpu7x:2x2x1
jax: 0.10.0
libtpu: 0.0.40
codegen_flags: <defaults>
</compile_context>

<pallas_src>
import functools

import jax
import jax.numpy as jnp
import numpy as np
from jax.experimental import pallas as pl
from jax.experimental.pallas import tpu as pltpu


def _round_up(v, m):
    return (v + m - 1) // m * m


# -----------------------------------------------------------------------------
# In-kernel helpers
# -----------------------------------------------------------------------------
def _softmax(logits):
    m = jnp.max(logits, axis=-1, keepdims=True)
    p = jnp.exp(logits - m)
    s = jnp.sum(p, axis=-1, keepdims=True)
    return p * pl.reciprocal(s, approx=True)     # EUP reciprocal instead of VALU divide


# -----------------------------------------------------------------------------
# Kernel
# -----------------------------------------------------------------------------
def _ple_kernel(x_ref, wt_ref, bt_ref, ws_ref, bs_ref, rep_ref, red_ref, out_ref, *,
                task_num, exp_per_task, shared_num, expert_size, if_last,
                gate_off_t, gate_off_s):
    P, S, E = exp_per_task, shared_num, expert_size
    n_exp = task_num * P + S
    gate_dim = P + S
    PE, SE = P * E, S * E

    # ---- shared input: all shared experts (+ shared gate logits) in ONE bf16 dot ---
    hs = (jnp.dot(x_ref[task_num], ws_ref[...], preferred_element_type=jnp.float32)
          + bs_ref[...])                                               # (bt, Ws_pad) f32
    shared_exp = jnp.maximum(hs[:, :SE], 0.0)                          # (bt, S*E)

    # ---- each task input: own experts + own gate logits in ONE bf16 dot ------------
    task_exps, gate_parts = [], []
    for i in range(task_num):
        ht = (jnp.dot(x_ref[i], wt_ref[i], preferred_element_type=jnp.float32)
              + bt_ref[i])                                             # (bt, Wt_pad) f32
        task_exps.append(jnp.maximum(ht[:, :PE], 0.0))                 # (bt, P*E)
        gate_parts.append(_softmax(ht[:, gate_off_t:gate_off_t + gate_dim]))

    # ---- one fused gated mixture for ALL outputs ------------------------------------
    # CUR lays the per-output expert blocks lane-wise; G concatenates the matching
    # gates; GREP = G @ REP replicates every gate over its expert's E lanes; the final
    # block-diagonal RED matmul sums each output's experts and lands the result
    # directly in the 128-padded output slab.
    cur_parts = []
    for i in range(task_num):
        cur_parts += [task_exps[i], shared_exp]
    if not if_last:
        cur_parts += task_exps + [shared_exp]
        gate_parts.append(_softmax(hs[:, gate_off_s:gate_off_s + n_exp]))

    cur = jnp.concatenate(cur_parts, axis=-1)                          # (bt, CUR_W) f32
    g = jnp.concatenate(gate_parts, axis=-1)                           # (bt, G_total)
    grep = jnp.dot(g, rep_ref[...], preferred_element_type=jnp.float32)
    out_ref[...] = jnp.dot(cur * grep, red_ref[...],
                           preferred_element_type=jnp.float32).astype(out_ref.dtype)


# -----------------------------------------------------------------------------
# Wrapper
# -----------------------------------------------------------------------------
def _pick_bt(B):
    """Batch tile: prefer >=2 grid steps (v7x dual TC), multiple of 16 (bf16 sublane)."""
    if B <= 16:
        return B
    for bt in (512, 256, 128, 64, 32, 16):
        if B % bt == 0 and B // bt >= 2:
            return bt
    return B  # non-multiple batch: whole batch in one step (full-dim block is legal)


def single_ple_layer(x, w_exp, b_exp, w_gate, b_gate, w_gs, b_gs,
                     *, task_num, exp_per_task, shared_num, if_last):
    """x: (task_num+1, B, F).  Returns a list of n_out arrays of shape (B, E)."""
    P, S = exp_per_task, shared_num
    n_exp, gate_dim = task_num * P + S, P + S
    _, B, F = x.shape
    E = w_exp.shape[-1]
    PE, SE = P * E, S * E
    n_out = task_num + (0 if if_last else 1)
    f32, bf16 = jnp.float32, jnp.bfloat16

    # ---- pre-pack weights into wide, 128-aligned slabs (do once in a real model) ----
    # Gate columns start at a 128-aligned lane offset so in-kernel slices are aligned.
    gate_off_t = _round_up(PE, 128)
    Wt_pad = _round_up(gate_off_t + gate_dim, 128)
    gate_off_s = _round_up(SE, 128)
    Ws_pad = _round_up(gate_off_s + n_exp, 128) if not if_last else _round_up(SE, 128)

    w_exp_t = (w_exp[:task_num * P].reshape(task_num, P, F, E)
               .transpose(0, 2, 1, 3).reshape(task_num, F, PE))
    b_exp_t = (b_exp[:task_num * P].reshape(task_num, P, 1, E)
               .transpose(0, 2, 1, 3).reshape(task_num, 1, PE))
    w_task = jnp.zeros((task_num, F, Wt_pad), f32)
    w_task = w_task.at[:, :, :PE].set(w_exp_t)
    w_task = w_task.at[:, :, gate_off_t:gate_off_t + gate_dim].set(w_gate)
    b_task = jnp.zeros((task_num, 1, Wt_pad), f32)
    b_task = b_task.at[:, :, :PE].set(b_exp_t)
    b_task = b_task.at[:, :, gate_off_t:gate_off_t + gate_dim].set(b_gate)

    w_exp_s = w_exp[task_num * P:].transpose(1, 0, 2).reshape(F, SE)
    b_exp_s = b_exp[task_num * P:].transpose(1, 0, 2).reshape(1, SE)
    w_shared = jnp.zeros((F, Ws_pad), f32).at[:, :SE].set(w_exp_s)
    b_shared = jnp.zeros((1, Ws_pad), f32).at[:, :SE].set(b_exp_s)
    if not if_last:
        w_shared = w_shared.at[:, gate_off_s:gate_off_s + n_exp].set(w_gs)
        b_shared = b_shared.at[:, gate_off_s:gate_off_s + n_exp].set(b_gs)

    # bf16 matmul operands (native MXU); biases / accumulation stay f32.
    x_bf = x.astype(bf16)
    w_task = w_task.astype(bf16)
    w_shared = w_shared.astype(bf16)

    # ---- hoisted gating constants (numpy, built once, streamed in as VMEM inputs) ---
    G_total = task_num * gate_dim + (0 if if_last else n_exp)
    CUR_W = G_total * E
    W_out = n_out * E
    W_out_pad = _round_up(W_out, 128)

    rep_np = np.kron(np.eye(G_total, dtype=np.float32), np.ones((1, E), np.float32))
    red_np = np.zeros((CUR_W, W_out_pad), np.float32)
    row = 0
    for i in range(n_out):
        n_cur = gate_dim if i < task_num else n_exp
        red_np[row:row + n_cur * E, i * E:(i + 1) * E] = np.kron(
            np.ones((n_cur, 1), np.float32), np.eye(E, dtype=np.float32))
        row += n_cur * E
    rep = jnp.asarray(rep_np)
    red = jnp.asarray(red_np)

    # ---- batch tiling + explicit VMEM budget -----------------------------------------
    bt = _pick_bt(B)
    grid = (B // bt,)

    def _nbytes(shape, itemsize):
        return int(np.prod(shape)) * itemsize

    block_bytes = (
        2 * _nbytes((task_num + 1, bt, F), 2) +        # x (bf16, double-buffered)
        2 * _nbytes((task_num, F, Wt_pad), 2) +        # w_task (bf16)
        2 * _nbytes((task_num, 1, Wt_pad), 4) +        # b_task (f32)
        2 * _nbytes((F, Ws_pad), 2) +                  # w_shared (bf16)
        2 * _nbytes((1, Ws_pad), 4) +                  # b_shared (f32)
        2 * _nbytes((G_total, CUR_W), 4) +             # rep
        2 * _nbytes((CUR_W, W_out_pad), 4) +           # red
        2 * _nbytes((bt, W_out_pad), 4))               # out
    # margin for in-kernel f32 intermediates (ht/hs, cur, grep, product, ...)
    interm_bytes = 4 * bt * (task_num * Wt_pad + Ws_pad + 2 * CUR_W + W_out_pad) * 4
    vmem_limit = int(min(max(block_bytes + interm_bytes + (4 << 20), 16 << 20),
                         40 << 20))

    kernel = functools.partial(
        _ple_kernel, task_num=task_num, exp_per_task=P, shared_num=S,
        expert_size=E, if_last=if_last,
        gate_off_t=gate_off_t, gate_off_s=gate_off_s)

    out2d = pl.pallas_call(
        kernel,
        out_shape=jax.ShapeDtypeStruct((B, W_out_pad), f32),
        grid=grid,
        in_specs=[
            pl.BlockSpec((task_num + 1, bt, F), lambda b: (0, b, 0)),
            pl.BlockSpec((task_num, F, Wt_pad), lambda b: (0, 0, 0)),
            pl.BlockSpec((task_num, 1, Wt_pad), lambda b: (0, 0, 0)),
            pl.BlockSpec((F, Ws_pad), lambda b: (0, 0)),
            pl.BlockSpec((1, Ws_pad), lambda b: (0, 0)),
            pl.BlockSpec((G_total, CUR_W), lambda b: (0, 0)),
            pl.BlockSpec((CUR_W, W_out_pad), lambda b: (0, 0)),
        ],
        out_specs=pl.BlockSpec((bt, W_out_pad), lambda b: (b, 0)),
        compiler_params=pltpu.CompilerParams(
            dimension_semantics=("parallel",),
            vmem_limit_bytes=vmem_limit),
    )(x_bf, w_task, b_task, w_shared, b_shared, rep, red)

    # Cheap narrow slices back to the PyTorch-style list of (B, E) outputs
    # (no full-output transpose copy).
    return [out2d[:, i * E:(i + 1) * E] for i in range(n_out)]


# -----------------------------------------------------------------------------
# Pure-JAX reference (mirrors the PyTorch forward exactly).
# matmul_dtype=None -> pure f32; matmul_dtype=bf16 -> bf16 operands, f32 accumulation
# (matches the kernel's numerics for a tight-tolerance comparison).
# -----------------------------------------------------------------------------
def ple_reference(x, w_exp, b_exp, w_gate, b_gate, w_gs, b_gs,
                  *, task_num, exp_per_task, shared_num, if_last, matmul_dtype=None):
    def lin(xi, w, b):
        if matmul_dtype is not None:
            xi, w = xi.astype(matmul_dtype), w.astype(matmul_dtype)
        return jnp.dot(xi, w, preferred_element_type=jnp.float32) + b

    n_exp = task_num * exp_per_task + shared_num
    expert_outs = []
    for i in range(task_num):
        for j in range(exp_per_task):
            e = i * exp_per_task + j
            expert_outs.append(jax.nn.relu(lin(x[i], w_exp[e], b_exp[e, 0])))
    for s in range(shared_num):
        e = task_num * exp_per_task + s
        expert_outs.append(jax.nn.relu(lin(x[-1], w_exp[e], b_exp[e, 0])))
    outputs = []
    for i in range(task_num):
        gate = jax.nn.softmax(lin(x[i], w_gate[i], b_gate[i, 0]), axis=-1)
        cur = (expert_outs[i * exp_per_task:(i + 1) * exp_per_task]
               + expert_outs[n_exp - shared_num:])
        stacked = jnp.stack(cur, axis=1)                      # (B, n_cur, E)
        outputs.append(jnp.sum(stacked * gate[:, :, None], axis=1))
    if not if_last:
        gate = jax.nn.softmax(lin(x[-1], w_gs, b_gs[0]), axis=-1)
        stacked = jnp.stack(expert_outs, axis=1)              # (B, n_exp, E)
        outputs.append(jnp.sum(stacked * gate[:, :, None], axis=1))
    return outputs


# -----------------------------------------------------------------------------
if __name__ == "__main__":
    # Module config (synthetic, deterministic).
    task_num = 2
    exp_per_task = 2
    shared_num = 2
    input_feature_size = 32
    expert_size = 32
    if_last = False

    batch = 8
    n_exp = task_num * exp_per_task + shared_num
    gate_dim = exp_per_task + shared_num

    key = jax.random.PRNGKey(0)
    ks = jax.random.split(key, 8)
    # input_data: list of task_num+1 tensors -> stacked (task_num+1, B, F)
    x = jax.random.normal(ks[0], (task_num + 1, batch, input_feature_size), jnp.float32)
    w_exp = jax.random.normal(ks[1], (n_exp, input_feature_size, expert_size), jnp.float32) * 0.1
    b_exp = jax.random.normal(ks[2], (n_exp, 1, expert_size), jnp.float32) * 0.1
    w_gate = jax.random.normal(ks[3], (task_num, input_feature_size, gate_dim), jnp.float32) * 0.1
    b_gate = jax.random.normal(ks[4], (task_num, 1, gate_dim), jnp.float32) * 0.1
    w_gs = jax.random.normal(ks[5], (input_feature_size, n_exp), jnp.float32) * 0.1
    b_gs = jax.random.normal(ks[6], (1, n_exp), jnp.float32) * 0.1

    outs = single_ple_layer(
        x, w_exp, b_exp, w_gate, b_gate, w_gs, b_gs,
        task_num=task_num, exp_per_task=exp_per_task,
        shared_num=shared_num, if_last=if_last)
    outs = jax.block_until_ready(outs)

    # Tight check vs. a bf16-matched reference (same operand precision, f32 accum);
    # only the approx-reciprocal softmax and MXU rounding differ.
    ref_bf16 = ple_reference(
        x, w_exp, b_exp, w_gate, b_gate, w_gs, b_gs,
        task_num=task_num, exp_per_task=exp_per_task,
        shared_num=shared_num, if_last=if_last, matmul_dtype=jnp.bfloat16)
    for o, r in zip(outs, ref_bf16):
        np.testing.assert_allclose(np.asarray(o), np.asarray(r), rtol=2e-3, atol=2e-3)

    # Loose sanity check vs. the pure f32 reference (bf16 matmul operands in the kernel).
    ref_f32 = ple_reference(
        x, w_exp, b_exp, w_gate, b_gate, w_gs, b_gs,
        task_num=task_num, exp_per_task=exp_per_task,
        shared_num=shared_num, if_last=if_last, matmul_dtype=None)
    for o, r in zip(outs, ref_f32):
        np.testing.assert_allclose(np.asarray(o), np.asarray(r), rtol=5e-2, atol=5e-2)

    print("KERNEL_OK")
</pallas_src>

<mosaic_0001>
module attributes {stable_mosaic.version = 11 : i64} {
  func.func @_ple_kernel(%arg0: i32, %arg1: memref<3x8x32xbf16, #tpu.memory_space<vmem>>, %arg2: memref<2x32x256xbf16, #tpu.memory_space<vmem>>, %arg3: memref<2x1x256xf32, #tpu.memory_space<vmem>>, %arg4: memref<32x256xbf16, #tpu.memory_space<vmem>>, %arg5: memref<1x256xf32, #tpu.memory_space<vmem>>, %arg6: memref<14x448xf32, #tpu.memory_space<vmem>>, %arg7: memref<448x128xf32, #tpu.memory_space<vmem>>, %arg8: memref<8x128xf32, #tpu.memory_space<vmem>>) attributes {dimension_semantics = [#tpu.dimension_semantics<parallel>], iteration_bounds = array<i64: 1>, scalar_prefetch = 0 : i64, scratch_operands = 0 : i64, tpu.core_type = #tpu.core_type<tc>, window_params = [{transform_indices = @transform_0, window_bounds = array<i64: 3, 8, 32>}, {pipeline_mode = #tpu.pipeline_mode<synchronous>, transform_indices = @transform_1, window_bounds = array<i64: 2, 32, 256>}, {pipeline_mode = #tpu.pipeline_mode<synchronous>, transform_indices = @transform_2, window_bounds = array<i64: 2, 1, 256>}, {pipeline_mode = #tpu.pipeline_mode<synchronous>, transform_indices = @transform_3, window_bounds = array<i64: 32, 256>}, {pipeline_mode = #tpu.pipeline_mode<synchronous>, transform_indices = @transform_4, window_bounds = array<i64: 1, 256>}, {pipeline_mode = #tpu.pipeline_mode<synchronous>, transform_indices = @transform_5, window_bounds = array<i64: 14, 448>}, {pipeline_mode = #tpu.pipeline_mode<synchronous>, transform_indices = @transform_6, window_bounds = array<i64: 448, 128>}, {transform_indices = @transform_7, window_bounds = array<i64: 8, 128>}]} {
    %c2 = arith.constant 2 : index
    %c0 = arith.constant 0 : index
    %c0_0 = arith.constant 0 : index
    %0 = vector.load %arg1[%c2, %c0, %c0_0] : memref<3x8x32xbf16, #tpu.memory_space<vmem>>, vector<1x8x32xbf16>
    %1 = vector.shape_cast %0 : vector<1x8x32xbf16> to vector<8x32xbf16>
    %c0_1 = arith.constant 0 : index
    %c0_2 = arith.constant 0 : index
    %2 = vector.load %arg4[%c0_1, %c0_2] : memref<32x256xbf16, #tpu.memory_space<vmem>>, vector<32x256xbf16>
    %cst = arith.constant dense<0.000000e+00> : vector<8x256xf32>
    %3 = tpu.matmul %1, %2, %cst {dimension_numbers = #tpu.dot_dimension_numbers<[1], [0], [0], [1], [0, 0, 1, 1], [], []>} : vector<8x32xbf16>, vector<32x256xbf16>, vector<8x256xf32> -> vector<8x256xf32>
    %c0_3 = arith.constant 0 : index
    %c0_4 = arith.constant 0 : index
    %4 = vector.load %arg5[%c0_3, %c0_4] : memref<1x256xf32, #tpu.memory_space<vmem>>, vector<1x256xf32>
    %5 = vector.broadcast %4 : vector<1x256xf32> to vector<8x256xf32>
    %6 = arith.addf %3, %5 : vector<8x256xf32>
    %7 = vector.extract_strided_slice %6 {offsets = [0, 0], sizes = [8, 64], strides = [1, 1]} : vector<8x256xf32> to vector<8x64xf32>
    %cst_5 = arith.constant 0.000000e+00 : f32
    %8 = vector.broadcast %cst_5 : f32 to vector<8x64xf32>
    %9 = arith.maximumf %7, %8 : vector<8x64xf32>
    %c0_6 = arith.constant 0 : index
    %c0_7 = arith.constant 0 : index
    %c0_8 = arith.constant 0 : index
    %10 = vector.load %arg1[%c0_6, %c0_7, %c0_8] : memref<3x8x32xbf16, #tpu.memory_space<vmem>>, vector<1x8x32xbf16>
    %11 = vector.shape_cast %10 : vector<1x8x32xbf16> to vector<8x32xbf16>
    %c0_9 = arith.constant 0 : index
    %c0_10 = arith.constant 0 : index
    %c0_11 = arith.constant 0 : index
    %12 = vector.load %arg2[%c0_9, %c0_10, %c0_11] : memref<2x32x256xbf16, #tpu.memory_space<vmem>>, vector<1x32x256xbf16>
    %13 = vector.shape_cast %12 : vector<1x32x256xbf16> to vector<32x256xbf16>
    %cst_12 = arith.constant dense<0.000000e+00> : vector<8x256xf32>
    %14 = tpu.matmul %11, %13, %cst_12 {dimension_numbers = #tpu.dot_dimension_numbers<[1], [0], [0], [1], [0, 0, 1, 1], [], []>} : vector<8x32xbf16>, vector<32x256xbf16>, vector<8x256xf32> -> vector<8x256xf32>
    %c0_13 = arith.constant 0 : index
    %c0_14 = arith.constant 0 : index
    %c0_15 = arith.constant 0 : index
    %15 = vector.load %arg3[%c0_13, %c0_14, %c0_15] : memref<2x1x256xf32, #tpu.memory_space<vmem>>, vector<1x1x256xf32>
    %16 = vector.shape_cast %15 : vector<1x1x256xf32> to vector<1x256xf32>
    %17 = vector.broadcast %16 : vector<1x256xf32> to vector<8x256xf32>
    %18 = arith.addf %14, %17 : vector<8x256xf32>
    %19 = vector.extract_strided_slice %18 {offsets = [0, 0], sizes = [8, 64], strides = [1, 1]} : vector<8x256xf32> to vector<8x64xf32>
    %cst_16 = arith.constant 0.000000e+00 : f32
    %20 = vector.broadcast %cst_16 : f32 to vector<8x64xf32>
    %21 = arith.maximumf %19, %20 : vector<8x64xf32>
    %22 = vector.extract_strided_slice %18 {offsets = [0, 128], sizes = [8, 4], strides = [1, 1]} : vector<8x256xf32> to vector<8x4xf32>
    %cst_17 = arith.constant dense<0xFF800000> : vector<8xf32>
    %23 = vector.multi_reduction <maximumf>, %22, %cst_17 [1] : vector<8x4xf32> to vector<8xf32>
    %24 = vector.shape_cast %23 : vector<8xf32> to vector<8x1xf32>
    %25 = vector.broadcast %24 : vector<8x1xf32> to vector<8x4xf32>
    %26 = arith.subf %22, %25 : vector<8x4xf32>
    %27 = math.exp %26 : vector<8x4xf32>
    %cst_18 = arith.constant dense<0.000000e+00> : vector<8xf32>
    %28 = vector.multi_reduction <add>, %27, %cst_18 [1] : vector<8x4xf32> to vector<8xf32>
    %29 = vector.shape_cast %28 : vector<8xf32> to vector<8x1xf32>
    %30 = tpu.reciprocal %29 {approx = true} : vector<8x1xf32> -> vector<8x1xf32>
    %31 = vector.broadcast %30 : vector<8x1xf32> to vector<8x4xf32>
    %32 = arith.mulf %27, %31 : vector<8x4xf32>
    %c1 = arith.constant 1 : index
    %c0_19 = arith.constant 0 : index
    %c0_20 = arith.constant 0 : index
    %33 = vector.load %arg1[%c1, %c0_19, %c0_20] : memref<3x8x32xbf16, #tpu.memory_space<vmem>>, vector<1x8x32xbf16>
    %34 = vector.shape_cast %33 : vector<1x8x32xbf16> to vector<8x32xbf16>
    %c1_21 = arith.constant 1 : index
    %c0_22 = arith.constant 0 : index
    %c0_23 = arith.constant 0 : index
    %35 = vector.load %arg2[%c1_21, %c0_22, %c0_23] : memref<2x32x256xbf16, #tpu.memory_space<vmem>>, vector<1x32x256xbf16>
    %36 = vector.shape_cast %35 : vector<1x32x256xbf16> to vector<32x256xbf16>
    %cst_24 = arith.constant dense<0.000000e+00> : vector<8x256xf32>
    %37 = tpu.matmul %34, %36, %cst_24 {dimension_numbers = #tpu.dot_dimension_numbers<[1], [0], [0], [1], [0, 0, 1, 1], [], []>} : vector<8x32xbf16>, vector<32x256xbf16>, vector<8x256xf32> -> vector<8x256xf32>
    %c1_25 = arith.constant 1 : index
    %c0_26 = arith.constant 0 : index
    %c0_27 = arith.constant 0 : index
    %38 = vector.load %arg3[%c1_25, %c0_26, %c0_27] : memref<2x1x256xf32, #tpu.memory_space<vmem>>, vector<1x1x256xf32>
    %39 = vector.shape_cast %38 : vector<1x1x256xf32> to vector<1x256xf32>
    %40 = vector.broadcast %39 : vector<1x256xf32> to vector<8x256xf32>
    %41 = arith.addf %37, %40 : vector<8x256xf32>
    %42 = vector.extract_strided_slice %41 {offsets = [0, 0], sizes = [8, 64], strides = [1, 1]} : vector<8x256xf32> to vector<8x64xf32>
    %cst_28 = arith.constant 0.000000e+00 : f32
    %43 = vector.broadcast %cst_28 : f32 to vector<8x64xf32>
    %44 = arith.maximumf %42, %43 : vector<8x64xf32>
    %45 = vector.extract_strided_slice %41 {offsets = [0, 128], sizes = [8, 4], strides = [1, 1]} : vector<8x256xf32> to vector<8x4xf32>
    %cst_29 = arith.constant dense<0xFF800000> : vector<8xf32>
    %46 = vector.multi_reduction <maximumf>, %45, %cst_29 [1] : vector<8x4xf32> to vector<8xf32>
    %47 = vector.shape_cast %46 : vector<8xf32> to vector<8x1xf32>
    %48 = vector.broadcast %47 : vector<8x1xf32> to vector<8x4xf32>
    %49 = arith.subf %45, %48 : vector<8x4xf32>
    %50 = math.exp %49 : vector<8x4xf32>
    %cst_30 = arith.constant dense<0.000000e+00> : vector<8xf32>
    %51 = vector.multi_reduction <add>, %50, %cst_30 [1] : vector<8x4xf32> to vector<8xf32>
    %52 = vector.shape_cast %51 : vector<8xf32> to vector<8x1xf32>
    %53 = tpu.reciprocal %52 {approx = true} : vector<8x1xf32> -> vector<8x1xf32>
    %54 = vector.broadcast %53 : vector<8x1xf32> to vector<8x4xf32>
    %55 = arith.mulf %50, %54 : vector<8x4xf32>
    %56 = vector.extract_strided_slice %6 {offsets = [0, 128], sizes = [8, 6], strides = [1, 1]} : vector<8x256xf32> to vector<8x6xf32>
    %cst_31 = arith.constant dense<0xFF800000> : vector<8xf32>
    %57 = vector.multi_reduction <maximumf>, %56, %cst_31 [1] : vector<8x6xf32> to vector<8xf32>
    %58 = vector.shape_cast %57 : vector<8xf32> to vector<8x1xf32>
    %59 = vector.broadcast %58 : vector<8x1xf32> to vector<8x6xf32>
    %60 = arith.subf %56, %59 : vector<8x6xf32>
    %61 = math.exp %60 : vector<8x6xf32>
    %cst_32 = arith.constant dense<0.000000e+00> : vector<8xf32>
    %62 = vector.multi_reduction <add>, %61, %cst_32 [1] : vector<8x6xf32> to vector<8xf32>
    %63 = vector.shape_cast %62 : vector<8xf32> to vector<8x1xf32>
    %64 = tpu.reciprocal %63 {approx = true} : vector<8x1xf32> -> vector<8x1xf32>
    %65 = vector.broadcast %64 : vector<8x1xf32> to vector<8x6xf32>
    %66 = arith.mulf %61, %65 : vector<8x6xf32>
    %67 = tpu.concatenate %21, %9, %44, %9, %21, %44, %9 in 1 : vector<8x64xf32>, vector<8x64xf32>, vector<8x64xf32>, vector<8x64xf32>, vector<8x64xf32>, vector<8x64xf32>, vector<8x64xf32> -> vector<8x448xf32>
    %68 = tpu.concatenate %32, %55, %66 in 1 : vector<8x4xf32>, vector<8x4xf32>, vector<8x6xf32> -> vector<8x14xf32>
    %c0_33 = arith.constant 0 : index
    %c0_34 = arith.constant 0 : index
    %69 = vector.load %arg6[%c0_33, %c0_34] : memref<14x448xf32, #tpu.memory_space<vmem>>, vector<14x448xf32>
    %cst_35 = arith.constant dense<0.000000e+00> : vector<8x448xf32>
    %70 = tpu.matmul %68, %69, %cst_35 {dimension_numbers = #tpu.dot_dimension_numbers<[1], [0], [0], [1], [0, 0, 1, 1], [], []>} : vector<8x14xf32>, vector<14x448xf32>, vector<8x448xf32> -> vector<8x448xf32>
    %71 = arith.mulf %67, %70 : vector<8x448xf32>
    %c0_36 = arith.constant 0 : index
    %c0_37 = arith.constant 0 : index
    %72 = vector.load %arg7[%c0_36, %c0_37] : memref<448x128xf32, #tpu.memory_space<vmem>>, vector<448x128xf32>
    %cst_38 = arith.constant dense<0.000000e+00> : vector<8x128xf32>
    %73 = tpu.matmul %71, %72, %cst_38 {dimension_numbers = #tpu.dot_dimension_numbers<[1], [0], [0], [1], [0, 0, 1, 1], [], []>} : vector<8x448xf32>, vector<448x128xf32>, vector<8x128xf32> -> vector<8x128xf32>
    %c0_39 = arith.constant 0 : index
    %c0_40 = arith.constant 0 : index
    %74 = vector.load %arg8[%c0_39, %c0_40] : memref<8x128xf32, #tpu.memory_space<vmem>>, vector<8x128xf32>
    tpu.vector_store %arg8[%c0_39, %c0_40], %73 {strides = array<i32>} : memref<8x128xf32, #tpu.memory_space<vmem>>, vector<8x128xf32>,
    return
  }
  func.func @transform_0(%arg0: i32) -> (i32, i32, i32) {
    %c0_i32 = arith.constant 0 : i32
    %c0_i32_0 = arith.constant 0 : i32
    %c0_i32_1 = arith.constant 0 : i32
    return %c0_i32, %arg0, %c0_i32_0 : i32, i32, i32
  }
  func.func @transform_1(%arg0: i32) -> (i32, i32, i32) {
    %c0_i32 = arith.constant 0 : i32
    %c0_i32_0 = arith.constant 0 : i32
    %c0_i32_1 = arith.constant 0 : i32
    %c0_i32_2 = arith.constant 0 : i32
    return %c0_i32, %c0_i32_0, %c0_i32_1 : i32, i32, i32
  }
  func.func @transform_2(%arg0: i32) -> (i32, i32, i32) {
    %c0_i32 = arith.constant 0 : i32
    %c0_i32_0 = arith.constant 0 : i32
    %c0_i32_1 = arith.constant 0 : i32
    %c0_i32_2 = arith.constant 0 : i32
    return %c0_i32, %c0_i32_0, %c0_i32_1 : i32, i32, i32
  }
  func.func @transform_3(%arg0: i32) -> (i32, i32) {
    %c0_i32 = arith.constant 0 : i32
    %c0_i32_0 = arith.constant 0 : i32
    %c0_i32_1 = arith.constant 0 : i32
    return %c0_i32, %c0_i32_0 : i32, i32
  }
  func.func @transform_4(%arg0: i32) -> (i32, i32) {
    %c0_i32 = arith.constant 0 : i32
    %c0_i32_0 = arith.constant 0 : i32
    %c0_i32_1 = arith.constant 0 : i32
    return %c0_i32, %c0_i32_0 : i32, i32
  }
  func.func @transform_5(%arg0: i32) -> (i32, i32) {
    %c0_i32 = arith.constant 0 : i32
    %c0_i32_0 = arith.constant 0 : i32
    %c0_i32_1 = arith.constant 0 : i32
    return %c0_i32, %c0_i32_0 : i32, i32
  }
  func.func @transform_6(%arg0: i32) -> (i32, i32) {
    %c0_i32 = arith.constant 0 : i32
    %c0_i32_0 = arith.constant 0 : i32
    %c0_i32_1 = arith.constant 0 : i32
    return %c0_i32, %c0_i32_0 : i32, i32
  }
  func.func @transform_7(%arg0: i32) -> (i32, i32) {
    %c0_i32 = arith.constant 0 : i32
    %c0_i32_0 = arith.constant 0 : i32
    return %arg0, %c0_i32 : i32, i32
  }
}

</mosaic_0001>

<bundles_post_ra>
// kernel: tpu_custom_call.1
= control target key start
LH: loop header
LB: loop body
LE: loop exit
PB: predicated region body
PF: predicated region fallthrough
CT: control target
= control target key end

     0   :  { %12 = vsyncpa [#allocation3], 0  ;;  %s1343_s0 = inlined_call_operand.hbm [shape: bf16[3,8,32], index: 0, kind: input, shape index: {}]   ;;  %s1344_s1 = inlined_call_operand.hbm [shape: bf16[2,32,256], index: 1, kind: input, shape index: {}]   ;;  %s1345_s2 = inlined_call_operand.vmem [shape: f32[2,1,256], index: 2, kind: input, shape index: {}]   ;;  %s1346_s3 = inlined_call_operand.hbm [shape: bf16[32,256], index: 3, kind: input, shape index: {}]   ;;  %s1347_s4 = inlined_call_operand.vmem [shape: f32[1,256], index: 4, kind: input, shape index: {}]   ;;  %s1348_s5 = inlined_call_operand.hbm [shape: f32[14,448], index: 5, kind: input, shape index: {}]   ;;  %s1349_s6 = inlined_call_operand.hbm [shape: f32[448,128], index: 6, kind: input, shape index: {}]   ;;  %s1350_s7 = inlined_call_operand.hbm [shape: f32[8,128], index: 7, kind: output, shape index: {}]  }
   0x1   :  { %13 = vsyncpa [#allocation6], 0 }
   0x2   :  { %14 = vsyncpa [#allocation9], 0 }
   0x3   :  { %15 = vsyncpa [#allocation4], 0  ;;  %s1117_s24 = smov [#allocation5]   ;;  %s977_s28 = scalar_lea.hbm %s1344_s1, 1024 }
   0x4   :  { %s33_s25 = sshll.u32 %s1117_s24, 4  ;;  %p978_p0 = scmp.ne.s32.totalorder %s1344_s1, %s977_s28  ;;  %s34_s25 = int_to_ptr.vmem [resolvable:$true] %s33_s25 }
   0x5   :  { %p981_p1 = scmp.lt.u32.totalorder %s977_s28, %s1344_s1 }
   0x7   :  { %p983_p2 = pnand %p981_p1, %p978_p0 }
   0x9   :  { %986 = shalt.err (!%p983_p2)
}
   0xa   :  { %s987_s10 = scalar_lea.vmem %s34_s25, 1024  ;;  %p992_p4 = scmp.lt.s32.totalorder %s34_s25, %s34_s25 }
   0xb   :  { %p988_p3 = scmp.ne.s32.totalorder %s34_s25, %s987_s10  ;;  %p993_p5 = scmp.lt.s32.totalorder %s987_s10, %s987_s10 }
   0xd   :  { %p994_p6 = por %p993_p5, %p992_p4 }
   0xf   :  { %p995_p7 = pnand %p994_p6, %p988_p3 }
  0x11   :  { %998 = shalt.err (!%p995_p7)
}
  0x12   :  { %s1118_s11 = smov 128   ;;  %s1119_s12 = smov 8  }
  0x13   :  { %39 = dma.hbm_to_vmem [thread:$0]  %s1344_s1, 1024, %s34_s25, [#allocation6], %s1118_s11, %s1118_s11, %s1119_s12  }
  0x14   :  { %s1120_s15 = smov [#allocation8]   ;;  %s999_s19 = scalar_lea.hbm %s1348_s5, 1024 }
  0x15   :  { %s61_s16 = sshll.u32 %s1120_s15, 4  ;;  %p1000_p8 = scmp.ne.s32.totalorder %s1348_s5, %s999_s19  ;;  %s62_s16 = int_to_ptr.vmem [resolvable:$true] %s61_s16 }
  0x16   :  { %p1003_p9 = scmp.lt.u32.totalorder %s999_s19, %s1348_s5 }
  0x18   :  { %p1005_p10 = pnand %p1003_p9, %p1000_p8 }
  0x1a   :  { %1008 = shalt.err (!%p1005_p10)
}
  0x1b   :  { %s1009_s24 = scalar_lea.vmem %s62_s16, 1024  ;;  %p1014_p12 = scmp.lt.s32.totalorder %s62_s16, %s62_s16 }
  0x1c   :  { %p1010_p11 = scmp.ne.s32.totalorder %s62_s16, %s1009_s24  ;;  %p1015_p13 = scmp.lt.s32.totalorder %s1009_s24, %s1009_s24 }
  0x1e   :  { %p1016_p0 = por %p1015_p13, %p1014_p12 }
  0x20   :  { %p1017_p1 = pnand %p1016_p0, %p1010_p11 }
  0x22   :  { %1020 = shalt.err (!%p1017_p1)
}
  0x23   :  { %s1121_s1 = smov 512   ;;  %s1122_s25 = smov 32  }
  0x24   :  { %67 = dma.hbm_to_vmem [thread:$0]  %s1348_s5, 1024, %s62_s16, [#allocation9], %s1121_s1, %s1121_s1, %s1122_s25  }
  0x25   :  { %s1123_s28 = smov [#allocation2]   ;;  %s1021_s9 = scalar_lea.hbm %s1343_s0, 192 }
  0x26   :  { %s21_s29 = sshll.u32 %s1123_s28, 4  ;;  %p1022_p2 = scmp.ne.s32.totalorder %s1343_s0, %s1021_s9  ;;  %s22_s29 = int_to_ptr.vmem [resolvable:$true] %s21_s29 }
  0x27   :  { %p1025_p3 = scmp.lt.u32.totalorder %s1021_s9, %s1343_s0 }
  0x29   :  { %p1027_p4 = pnand %p1025_p3, %p1022_p2 }
  0x2b   :  { %1030 = shalt.err (!%p1027_p4)
}
  0x2c   :  { %s1031_s17 = scalar_lea.vmem %s22_s29, 192  ;;  %p1036_p6 = scmp.lt.s32.totalorder %s22_s29, %s22_s29 }
  0x2d   :  { %p1032_p5 = scmp.ne.s32.totalorder %s22_s29, %s1031_s17  ;;  %p1037_p7 = scmp.lt.s32.totalorder %s1031_s17, %s1031_s17 }
  0x2f   :  { %p1038_p8 = por %p1037_p7, %p1036_p6 }
  0x31   :  { %p1039_p9 = pnand %p1038_p8, %p1032_p5 }
  0x33   :  { %1042 = shalt.err (!%p1039_p9)
}
  0x34   :  { %s1124_s5 = smov 64   ;;  %s1125_s16 = smov 4  }
  0x35   :  { %27 = dma.hbm_to_vmem [thread:$0]  %s1343_s0, 192, %s22_s29, [#allocation3], %s1124_s5, %s1124_s5, %s1125_s16  }
  0x36   :  { %s1126_s20 = smov [#allocation7]   ;;  %s1127_s22 = smov [#allocation10]  }
  0x37   :  { %s47_s21 = sshll.u32 %s1126_s20, 4  ;;  %s73_s23 = sshll.u32 %s1127_s22, 4  ;;  %s48_s21 = int_to_ptr.vmem [resolvable:$true] %s47_s21  ;;  %s74_s23 = int_to_ptr.vmem [resolvable:$true] %s73_s23 }
  0x38   :  { %s1043_s25 = scalar_lea.hbm %s1346_s3, 512 }
  0x39   :  { %p1044_p10 = scmp.ne.s32.totalorder %s1346_s3, %s1043_s25  ;;  %p1047_p11 = scmp.lt.u32.totalorder %s1043_s25, %s1346_s3 }
  0x3b   :  { %p1049_p12 = pnand %p1047_p11, %p1044_p10 }
  0x3d   :  { %1052 = shalt.err (!%p1049_p12)
}
  0x3e   :  { %s1053_s0 = scalar_lea.vmem %s48_s21, 512  ;;  %p1058_p0 = scmp.lt.s32.totalorder %s48_s21, %s48_s21 }
  0x3f   :  { %p1054_p13 = scmp.ne.s32.totalorder %s48_s21, %s1053_s0  ;;  %p1059_p1 = scmp.lt.s32.totalorder %s1053_s0, %s1053_s0 }
  0x41   :  { %p1060_p2 = por %p1059_p1, %p1058_p0 }
  0x43   :  { %p1061_p3 = pnand %p1060_p2, %p1054_p13 }
  0x45   :  { %1064 = shalt.err (!%p1061_p3)
}
  0x46   :  { %53 = dma.hbm_to_vmem [thread:$0]  %s1346_s3, 512, %s48_s21, [#allocation6], %s1118_s11, %s1118_s11, %s1119_s12  }
  0x47   :  { %s1065_s13 = scalar_lea.hbm %s1349_s6, 7168 }
  0x48   :  { %p1066_p4 = scmp.ne.s32.totalorder %s1349_s6, %s1065_s13  ;;  %p1069_p5 = scmp.lt.u32.totalorder %s1065_s13, %s1349_s6 }
  0x4a   :  { %p1071_p6 = pnand %p1069_p5, %p1066_p4 }
  0x4c   :  { %1074 = shalt.err (!%p1071_p6)
}
  0x4d   :  { %s1075_s19 = scalar_lea.vmem %s74_s23, 7168  ;;  %p1080_p8 = scmp.lt.s32.totalorder %s74_s23, %s74_s23 }
  0x4e   :  { %p1076_p7 = scmp.ne.s32.totalorder %s74_s23, %s1075_s19  ;;  %p1081_p9 = scmp.lt.s32.totalorder %s1075_s19, %s1075_s19 }
  0x50   :  { %p1082_p10 = por %p1081_p9, %p1080_p8 }
  0x52   :  { %p1083_p11 = pnand %p1082_p10, %p1076_p7 }
  0x54   :  { %1086 = shalt.err (!%p1083_p11)
}
  0x55   :  { %79 = dma.hbm_to_vmem [thread:$0]  %s1349_s6, 7168, %s74_s23, [#allocation9], %s1118_s11, %s1118_s11, %s1119_s12  }
  0x56   :  { %1109 = dma.done.wait [#allocation3], 192  }
  0x57   :  { %1110 = vsyncadd [#allocation3], 4294967104 }
  0x58   :  { %1111 = dma.done.wait [#allocation6], 1536  }
  0x59   :  { %1112 = vsyncadd [#allocation6], 4294965760 }
  0x5a   :  { %1113 = dma.done.wait [#allocation9], 8192  }
  0x5b   :  { %1114 = vsyncadd [#allocation9], 4294959104  ;;  %v1128_v0 = vmov 0   ;;  %v947_v1 = vld [vmem:[#allocation7 + $0x4] ss:$8 sps:$4 sm:$0xff]   ;;  %vm134_vm0 = vcmask 261120   ;;  %v104_v16 = vlaneseq }
  0x5c   :  { %170 = vmatprep.mubr.bf16.mxu0 %v1128_v0  ;;  %v949_v2 = vld [vmem:[#allocation7] ss:$8 sps:$4 sm:$0xff]   ;;  %138 = vmatprep.subr.bf16.mxu0 %v947_v1  ;;  %v950_v3 = vld [vmem:[#allocation7 + $0x14] ss:$8 sps:$4 sm:$0xff]   ;;  %v952_v4 = vld [vmem:[#allocation7 + $0x10] ss:$8 sps:$4 sm:$0xff]  }
  0x5d   :  { %139 = vmatpush1.bf16.msra.mxu0 %v949_v2  ;;  %v955_v5 = vld [vmem:[#allocation5 + $0x4] ss:$8 sps:$4 sm:$0xff]   ;;  %v97_v6 = vld [vmem:[#allocation2 + $0x8] sm:$0xf]  ;;  %v953_v7 = vld [vmem:[#allocation5] ss:$8 sps:$4 sm:$0xff]  }
  0x5e   :  { %140 = vmatprep.subr.bf16.mxu0 %v950_v3  ;;  %v958_v8 = vld [vmem:[#allocation5 + $0x14] ss:$8 sps:$4 sm:$0xff]   ;;  %v956_v9 = vld [vmem:[#allocation5 + $0x10] ss:$8 sps:$4 sm:$0xff]   ;;  %v961_v10 = vld [vmem:[#allocation5 + $0x24] ss:$8 sps:$4 sm:$0xff]  }
  0x5f   :  { %v180_v11 = vld [vmem:[#allocation2] sm:$0xf]  ;;  %v959_v12 = vld [vmem:[#allocation5 + $0x20] ss:$8 sps:$4 sm:$0xff]   ;;  %v962_v14 = vld [vmem:[#allocation5 + $0x30] ss:$8 sps:$4 sm:$0xff]  }
  0x60   :  { %v964_v13 = vld [vmem:[#allocation5 + $0x34] ss:$8 sps:$4 sm:$0xff]   ;;  %v275_v15 = vld [vmem:[#allocation2 + $0x4] sm:$0xf]  ;;  %v105_v17 = vshrl.u32 %v104_v16, 7  ;;  %vm262_vm1 = vcmask 31744  }
  0x61   :  { %141 = vmatpush1.bf16.msra.mxu0 %v952_v4  ;;  %v185_v21 = vld [vmem:[%s1345_s2] sm:$0x3]  ;;  %v803_v32 = vld [vmem:[%s1345_s2 + $0x2] sm:$0x3]  ;;  %vm370_vm2 = vcmask 48128   ;;  %vm417_vm3 = vcmask 1045504  }
  0x62   :  { %220 = vmatprep.subr.bf16.mxu0 %v955_v5  ;;  %v1253_v22 = vsub.s32 0, %v105_v17  ;;  %v110_v24 = vsub.s32 1, %v105_v17  ;;  %v1265_v35 = vld [vmem:[%s1347_s4] sm:$0x3]  ;;  %v410_v1 = vld [vmem:[#allocation8 + $0x28] sm:$0x3f] }
  0x63   :  { %v405_v3 = vld [vmem:[#allocation8] sm:$0xff]  ;;  %vm1129_vm4 = vmmov 1   ;;  %vm403_vm6 = vcmask 64512   ;;  %vm413_vm7 = vcmask 113664   ;;  %v614_v5 = vld [vmem:[#allocation10 + $0x130] sm:$0xff]  ;;  %vm390_vm8 = vcmask 523264  }
  0x64   :  { %797 = vmatmul.mubr.msk.bf16.vlgmr.msra.gmra.mrb[0].mxu0 %vm134_vm0, %v97_v6  ;;  %v190_v25 = vrot.slane %v185_v21, %v1253_v22  ;;  %v194_v26 = vrot.slane %v185_v21, %v110_v24  ;;  %v287_v36 = vrot.slane %v803_v32, %v1253_v22  ;;  %v291_v37 = vrot.slane %v803_v32, %v110_v24  ;;  %v409_v4 = vld [vmem:[#allocation8 + $0x20] sm:$0x3f]  ;;  %vm1279_vm5 = vmpackc.low %vm417_vm3, %vm1129_vm4  ;;  %s1132_s2 = smov [#allocation11]  }
  0x65   :  { %221 = vmatpush1.bf16.msra.mxu0 %v953_v7  ;;  %252 = vmatprep.mubr.bf16.mxu0 %v1128_v0  ;;  %v111_v38 = vrot.slane %v1265_v35, %v110_v24  ;;  %v854_v6 = vpack.c.bf16 %v409_v4, %v405_v3  ;;  %v576_v24 = vld [vmem:[#allocation10] sm:$0xff]  ;;  %v407_v3 = vld [vmem:[#allocation8 + $0x10] sm:$0xff]  ;;  %s782_s4 = sshll.u32 %s1132_s2, 4  ;;  %s783_s4 = int_to_ptr.vmem [resolvable:$true] %s782_s4 }
  0x66   :  { %222 = vmatprep.subr.bf16.mxu0 %v958_v8  ;;  %v408_v8 = vld [vmem:[#allocation8 + $0x18] sm:$0xff]  ;;  %v411_v4 = vld [vmem:[#allocation8 + $0x30] sm:$0x3f]  ;;  %p1092_p13 = scmp.lt.s32.totalorder %s783_s4, %s783_s4 }
  0x69   :  { %223 = vmatpush1.bf16.msra.mxu0 %v956_v9  ;;  %v412_v9 = vld [vmem:[#allocation8 + $0x38] sm:$0x3f] }
  0x6a   :  { %317 = vmatprep.subr.bf16.mxu0 %v961_v10  ;;  %v857_v10 = vpack.c.bf16 %v412_v9, %v408_v8  ;;  %v860_v8 = vpack.c.bf16 %v411_v4, %v407_v3 }
  0x6c   :  { %802 = vmatmul.mubr.msk.bf16.vlgmr.msra.gmra.mrb[4].mxu0 %vm134_vm0, %v180_v11  ;;  %v1130_v11 = vmov 0.0  }
  0x6d   :  { %318 = vmatpush1.bf16.msra.mxu0 %v959_v12  ;;  %349 = vmatprep.mubr.bf16.mxu0 %v1128_v0  ;;  %v406_v0 = vld [vmem:[#allocation8 + $0x8] sm:$0xff] }
  0x6e   :  { %319 = vmatprep.subr.bf16.mxu0 %v964_v13  ;;  %v851_v2 = vpack.c.bf16 %v410_v1, %v406_v0  ;;  %494 = vmatprep.mubr.f32.mxu1 %v1130_v11 }
  0x70   :  { %853 = vmatprep.subr.msk.bf16.mxu1 %vm1279_vm5, %v851_v2 }
  0x71   :  { %320 = vmatpush1.bf16.msra.mxu0 %v962_v14  ;;  %856 = vmatpush1.bf16.msk.msra.mxu1 %vm1279_vm5, %v854_v6  ;;  %v107_v14 = vrot.slane %v1265_v35, %v1253_v22  ;;  %v594_v22 = vld [vmem:[#allocation10 + $0x90] sm:$0xff] }
  0x72   :  { %859 = vmatprep.subr.msk.bf16.mxu1 %vm1279_vm5, %v857_v10 }
  0x74   :  { %808 = vmatmul.mubr.msk.bf16.vlgmr.msra.gmra.mrb[8].mxu0 %vm134_vm0, %v275_v15 }
 0x137   :  { %v1248_v18 = vpop.f32.mrb[0].mxu0 }
 0x138   :  { %v174_v19 = vpop.f32.mrb[1].mxu0  ;;  %v1294_v16 = vadd.f32 %v1248_v18, %v107_v14  ;;  %v595_v18 = vld [vmem:[#allocation10 + $0x98] sm:$0xff] }
 0x139   :  { %v176_v20 = vpop.f32.mrb[2].mxu0  ;;  %v175_v45 = vadd.f32 %v174_v19, %v111_v38  ;;  %v592_v19 = vld [vmem:[#allocation10 + $0x80] sm:$0xff] }
 0x13a   :  { %v177_v23 = vpop.f32.mrb[3].mxu0  ;;  %v593_v20 = vld [vmem:[#allocation10 + $0x88] sm:$0xff]  ;;  %v179_v21 = vmax.f32 %v1294_v16, 0.0 }
 0x13b   :  { %v371_v47 = vsel %vm370_vm2, %v175_v45, -inf  ;;  %v863_v23 = vpack.c.bf16 %v593_v20, %v592_v19  ;;  %v611_v19 = vld [vmem:[#allocation10 + $0x118] sm:$0xff] }
 0x13d   :  { %864 = vmatprep.subr.bf16.mxu0 %v863_v23  ;;  %v612_v23 = vld [vmem:[#allocation10 + $0x120] sm:$0xff] }
 0x13f   :  { %v254_v27 = vpop.f32.mrb[4].mxu0 }
 0x140   :  { %v1256_v28 = vadd.f32 %v254_v27, %v190_v25  ;;  %v256_v29 = vpop.f32.mrb[5].mxu0  ;;  %v577_v25 = vld [vmem:[#allocation10 + $0x8] sm:$0xff] }
 0x141   :  { %v257_v30 = vadd.f32 %v256_v29, %v194_v26  ;;  %v258_v31 = vpop.f32.mrb[6].mxu0  ;;  %v865_v26 = vpack.c.bf16 %v577_v25, %v576_v24  ;;  %v867_v29 = vpack.c.bf16 %v595_v18, %v594_v22  ;;  %v613_v24 = vld [vmem:[#allocation10 + $0x128] sm:$0xff]  ;;  %v616_v22 = vld [vmem:[#allocation10 + $0x140] sm:$0xff] }
 0x142   :  { %v259_v33 = vpop.f32.mrb[7].mxu0  ;;  %v579_v31 = vld [vmem:[#allocation10 + $0x18] sm:$0xff]  ;;  %v902_v25 = vpack.c.bf16 %v613_v24, %v612_v23  ;;  %v617_v18 = vld [vmem:[#allocation10 + $0x148] sm:$0xff] }
 0x143   :  { %v263_v34 = vsel %vm262_vm1, %v257_v30, -inf  ;;  %866 = vmatpush3.bf16.msra.mxu0 %v865_v26  ;;  %v596_v33 = vld [vmem:[#allocation10 + $0xa0] sm:$0xff]  ;;  %v615_v26 = vld [vmem:[#allocation10 + $0x138] sm:$0xff] }
 0x144   :  { %264 = vmax.xlane.f32.xlu1 %v263_v34  ;;  %868 = vmatprep.subr.bf16.mxu0 %v867_v29  ;;  %v597_v34 = vld [vmem:[#allocation10 + $0xa8] sm:$0xff]  ;;  %v908_v29 = vpack.c.bf16 %v617_v18, %v616_v22 }
 0x145   :  { %v871_v35 = vpack.c.bf16 %v597_v34, %v596_v33  ;;  %v620_v33 = vld [vmem:[#allocation10 + $0x160] sm:$0xff]  ;;  %v621_v34 = vld [vmem:[#allocation10 + $0x168] sm:$0xff] }
 0x147   :  { %v351_v39 = vpop.f32.mrb[8].mxu0 }
 0x148   :  { %v1269_v40 = vadd.f32 %v351_v39, %v287_v36  ;;  %v353_v41 = vpop.f32.mrb[9].mxu0  ;;  %v580_v36 = vld [vmem:[#allocation10 + $0x20] sm:$0xff]  ;;  %v598_v39 = vld [vmem:[#allocation10 + $0xb0] sm:$0xff] }
 0x149   :  { %v354_v42 = vadd.f32 %v353_v41, %v291_v37  ;;  %v355_v43 = vpop.f32.mrb[10].mxu0  ;;  %v581_v37 = vld [vmem:[#allocation10 + $0x28] sm:$0xff]  ;;  %v599_v41 = vld [vmem:[#allocation10 + $0xb8] sm:$0xff] }
 0x14a   :  { %v356_v44 = vpop.f32.mrb[11].mxu0  ;;  %v358_v27 = vmax.f32 %v1269_v40, 0.0  ;;  %v873_v38 = vpack.c.bf16 %v581_v37, %v580_v36  ;;  %v582_v43 = vld [vmem:[#allocation10 + $0x30] sm:$0xff]  ;;  %v623_v37 = vld [vmem:[#allocation10 + $0x178] sm:$0xff] }
 0x14b   :  { %v359_v46 = vsel %vm262_vm1, %v354_v42, -inf  ;;  %v583_v44 = vld [vmem:[#allocation10 + $0x38] sm:$0xff]  ;;  %v622_v36 = vld [vmem:[#allocation10 + $0x170] sm:$0xff] }
 0x14c   :  { %360 = vmax.xlane.f32.xlu0 %v359_v46  ;;  %v600_v46 = vld [vmem:[#allocation10 + $0xc0] sm:$0xff] }
 0x150   :  { %372 = vmax.xlane.f32.xlu0 %v371_v47  ;;  %v601_v47 = vld [vmem:[#allocation10 + $0xc8] sm:$0xff] }
 0x1d1   :  { %v265_v48 = vpop.xlane.xlu1 %264 }
 0x1d2   :  { %v266_v49 = vsub.f32 %v257_v30, %v265_v48  ;;  %v578_v30 = vld [vmem:[#allocation10 + $0x10] sm:$0xff]  ;;  %v879_v48 = vpack.c.bf16 %v601_v47, %v600_v46  ;;  %v607_v47 = vld [vmem:[#allocation10 + $0xf8] sm:$0xff] }
 0x1d3   :  { %v869_v32 = vpack.c.bf16 %v579_v31, %v578_v30  ;;  %v618_v30 = vld [vmem:[#allocation10 + $0x150] sm:$0xff]  ;;  %v619_v31 = vld [vmem:[#allocation10 + $0x158] sm:$0xff] }
 0x1d4   :  { %v267_v52 = vmul.f32 1.442695, %v266_v49  ;;  %v584_v49 = vld [vmem:[#allocation10 + $0x40] sm:$0xff]  ;;  %v606_v46 = vld [vmem:[#allocation10 + $0xf0] sm:$0xff] }
 0x1d5   :  { %870 = vmatpush3.bf16.msra.mxu0 %v869_v32  ;;  %v911_v32 = vpack.c.bf16 %v619_v31, %v618_v30 }
 0x1d6   :  { %872 = vmatprep.subr.bf16.mxu0 %v871_v35  ;;  %v914_v35 = vpack.c.bf16 %v621_v34, %v620_v33 }
 0x1d9   :  { %v361_v50 = vpop.xlane.xlu0 %360  ;;  %874 = vmatpush3.bf16.msra.mxu0 %v873_v38  ;;  %v917_v38 = vpack.c.bf16 %v623_v37, %v622_v36 }
 0x1da   :  { %v362_v51 = vsub.f32 %v354_v42, %v361_v50  ;;  %v875_v42 = vpack.c.bf16 %v599_v41, %v598_v39  ;;  %v585_v50 = vld [vmem:[#allocation10 + $0x48] sm:$0xff]  ;;  %v624_v39 = vld [vmem:[#allocation10 + $0x180] sm:$0xff] }
 0x1db   :  { %v625_v41 = vld [vmem:[#allocation10 + $0x188] sm:$0xff] }
 0x1dc   :  { %v363_v53 = vmul.f32 1.442695, %v362_v51  ;;  %876 = vmatprep.subr.bf16.mxu0 %v875_v42  ;;  %v881_v51 = vpack.c.bf16 %v585_v50, %v584_v49  ;;  %v920_v42 = vpack.c.bf16 %v625_v41, %v624_v39  ;;  %v590_v49 = vld [vmem:[#allocation10 + $0x70] sm:$0xff]  ;;  %v591_v50 = vld [vmem:[#allocation10 + $0x78] sm:$0xff] }
 0x1dd   :  { %v373_v54 = vpop.xlane.xlu0 %372 }
 0x1de   :  { %965 = vpow2.f32 %v363_v53  ;;  %v374_v55 = vsub.f32 %v175_v45, %v373_v54  ;;  %v877_v45 = vpack.c.bf16 %v583_v44, %v582_v43  ;;  %v603_v53 = vld [vmem:[#allocation10 + $0xd8] sm:$0xff]  ;;  %v626_v43 = vld [vmem:[#allocation10 + $0x190] sm:$0xff] }
 0x1df   :  { %967 = vpow2.f32 %v267_v52  ;;  %v602_v52 = vld [vmem:[#allocation10 + $0xd0] sm:$0xff]  ;;  %v627_v44 = vld [vmem:[#allocation10 + $0x198] sm:$0xff] }
 0x1e0   :  { %v375_v56 = vmul.f32 1.442695, %v374_v55  ;;  %878 = vmatpush3.bf16.msra.mxu0 %v877_v45  ;;  %v883_v54 = vpack.c.bf16 %v603_v53, %v602_v52  ;;  %v586_v55 = vld [vmem:[#allocation10 + $0x50] sm:$0xff]  ;;  %v923_v45 = vpack.c.bf16 %v627_v44, %v626_v43  ;;  %v893_v52 = vpack.c.bf16 %v591_v50, %v590_v49  ;;  %v629_v53 = vld [vmem:[#allocation10 + $0x1a8] sm:$0xff] }
 0x1e1   :  { %880 = vmatprep.subr.bf16.mxu0 %v879_v48  ;;  %v891_v48 = vpack.c.bf16 %v607_v47, %v606_v46 }
 0x1e2   :  { %969 = vpow2.f32 %v375_v56  ;;  %v587_v56 = vld [vmem:[#allocation10 + $0x58] sm:$0xff] }
 0x1e4   :  { %882 = vmatpush3.bf16.msra.mxu0 %v881_v51  ;;  %v628_v51 = vld [vmem:[#allocation10 + $0x1a0] sm:$0xff] }
 0x1e5   :  { %884 = vmatprep.subr.bf16.mxu0 %v883_v54  ;;  %v926_v54 = vpack.c.bf16 %v629_v53, %v628_v51 }
 0x1e8   :  { %v966_v57 = vpop.eup %965 }
 0x1e9   :  { %v365_v58 = vsel %vm262_vm1, %v966_v57, 0.0  ;;  %v1274_v59 = vpop.eup %967 }
 0x1ea   :  { %366 = vadd.xlane.f32.xlu1 %v365_v58  ;;  %v269_v61 = vsel %vm262_vm1, %v1274_v59, 0.0  ;;  %v604_v58 = vld [vmem:[#allocation10 + $0xe0] sm:$0xff] }
 0x1ec   :  { %v970_v60 = vpop.eup %969 }
 0x1ed   :  { %v377_v62 = vsel %vm370_vm2, %v970_v60, 0.0 }
 0x1ee   :  { %270 = vadd.xlane.f32.xlu1 %v269_v61  ;;  %378 = vadd.xlane.f32.xlu0 %v377_v62  ;;  %v588_v62 = vld [vmem:[#allocation10 + $0x60] sm:$0xff] }
 0x277   :  { %v367_v63 = vpop.xlane.xlu1 %366 }
 0x278   :  { %971 = vrcp.f32 %v367_v63  ;;  %v589_v63 = vld [vmem:[#allocation10 + $0x68] sm:$0xff] }
 0x279   :  { %v889_v0 = vpack.c.bf16 %v589_v63, %v588_v62 }
 0x27b   :  { %v379_v7 = vpop.xlane.xlu0 %378  ;;  %v271_v1 = vpop.xlane.xlu1 %270 }
 0x27c   :  { %973 = vrcp.f32 %v379_v7 }
 0x27d   :  { %975 = vrcp.f32 %v271_v1 }
 0x282   :  { %v972_v12 = vpop.eup %971 }
 0x283   :  { %v369_v13 = vmul.f32 %v972_v12, %v966_v57  ;;  %v885_v57 = vpack.c.bf16 %v587_v56, %v586_v55  ;;  %v608_v12 = vld [vmem:[#allocation10 + $0x100] sm:$0xff]  ;;  %v630_v55 = vld [vmem:[#allocation10 + $0x1b0] sm:$0xff]  ;;  %v631_v56 = vld [vmem:[#allocation10 + $0x1b8] sm:$0xff] }
 0x285   :  { %395 = vrot.lane.b32.xlu0 %v369_v13, %s1125_s16  ;;  %886 = vmatpush3.bf16.msra.mxu0 %v885_v57  ;;  %v609_v13 = vld [vmem:[#allocation10 + $0x108] sm:$0xff]  ;;  %v929_v57 = vpack.c.bf16 %v631_v56, %v630_v55 }
 0x286   :  { %v974_v15 = vpop.eup %973 }
 0x287   :  { %v381_v17 = vmul.f32 %v974_v15, %v970_v60  ;;  %v605_v60 = vld [vmem:[#allocation10 + $0xe8] sm:$0xff]  ;;  %v976_v2 = vpop.eup %975  ;;  %v896_v15 = vpack.c.bf16 %v609_v13, %v608_v12 }
 0x288   :  { %v887_v61 = vpack.c.bf16 %v605_v60, %v604_v58  ;;  %v273_v7 = vmul.f32 %v976_v2, %v1274_v59  ;;  %v610_v59 = vld [vmem:[#allocation10 + $0x110] sm:$0xff]  ;;  %v261_v60 = vmax.f32 %v1256_v28, 0.0 }
 0x289   :  { %399 = vrot.lane.b32.xlu1 %v381_v17, %s1119_s12  ;;  %v1131_v17 = vmov 0.0|0.0   ;;  %v899_v20 = vpack.c.bf16 %v611_v19, %v610_v59  ;;  %s1087_s12 = scalar_lea.vmem %s783_s4, 128 }
 0x28a   :  { %888 = vmatprep.subr.bf16.mxu0 %v887_v61  ;;  %p1088_p12 = scmp.ne.s32.totalorder %s783_s4, %s1087_s12  ;;  %p1093_p0 = scmp.lt.s32.totalorder %s1087_s12, %s1087_s12 }
 0x28b   :  { %890 = vmatpush3.bf16.msra.mxu0 %v889_v0 }
 0x28c   :  { %892 = vmatprep.subr.bf16.mxu0 %v891_v48  ;;  %p1094_p1 = por %p1093_p0, %p1092_p13 }
 0x28d   :  { %383 = vrot.lane.b32.xlu1 %v179_v21, %s1124_s5 }
 0x28e   :  { %p1095_p2 = pnand %p1094_p1, %p1088_p12 }
 0x28f   :  { %894 = vmatpush3.bf16.msra.mxu0 %v893_v52 }
 0x291   :  { %387 = vrot.lane.b32.xlu1 %v358_v27, %s1124_s5 }
 0x2f7   :  { %v396_v6 = vpop.permute.xlu0 %395 }
 0x2f8   :  { %v402_v9 = vsel %vm262_vm1, %v273_v7, %v396_v6 }
 0x2fb   :  { %v400_v10 = vpop.permute.xlu1 %399 }
 0x2fc   :  { %v404_v14 = vsel %vm403_vm6, %v402_v9, %v400_v10 }
 0x2fd   :  { %811 = vmatmul.mubr.msk.f32.vlgmr.msra.gmra.mrb[0].mxu1 %vm413_vm7, %v404_v14 }
 0x2fe   :  { %862 = vmatpush1.bf16.msk.msra.mxu1 %vm1279_vm5, %v860_v8  ;;  %565 = vmatprep.mubr.f32.mxu1 %v1130_v11  ;;  %v905_v11 = vpack.c.bf16 %v615_v26, %v614_v5 }
 0x2ff   :  { %895 = vmatprep.subr.bf16.mxu1 %v1131_v17  ;;  %v384_v58 = vpop.permute.xlu1 %383 }
 0x300   :  { %v391_v61 = vsel %vm390_vm8, %v261_v60, %v384_v58  ;;  %v392_v1 = vsel %vm390_vm8, %v358_v27, %v384_v58 }
 0x301   :  { %814 = vmatmul.mubr.msk.f32.vlgmr.msra.gmra.mrb[2].mxu1 %vm413_vm7, %v404_v14 }
 0x302   :  { %897 = vmatpush1.bf16.msra.mxu1 %v896_v15 }
 0x303   :  { %898 = vmatprep.subr.bf16.mxu1 %v1131_v17  ;;  %v388_v63 = vpop.permute.xlu1 %387 }
 0x304   :  { %v393_v4 = vsel %vm390_vm8, %v261_v60, %v388_v63 }
 0x306   :  { %900 = vmatpush1.bf16.msra.mxu1 %v899_v20 }
 0x307   :  { %901 = vmatprep.subr.bf16.mxu1 %v1131_v17 }
 0x30a   :  { %903 = vmatpush1.bf16.msra.mxu1 %v902_v25 }
 0x30b   :  { %904 = vmatprep.subr.bf16.mxu1 %v1131_v17 }
 0x30e   :  { %906 = vmatpush1.bf16.msra.mxu1 %v905_v11 }
 0x30f   :  { %907 = vmatprep.subr.bf16.mxu1 %v1131_v17 }
 0x312   :  { %909 = vmatpush1.bf16.msra.mxu1 %v908_v29 }
 0x313   :  { %910 = vmatprep.subr.bf16.mxu1 %v1131_v17 }
 0x316   :  { %912 = vmatpush1.bf16.msra.mxu1 %v911_v32 }
 0x317   :  { %913 = vmatprep.subr.bf16.mxu1 %v1131_v17 }
 0x31a   :  { %915 = vmatpush1.bf16.msra.mxu1 %v914_v35 }
 0x31b   :  { %916 = vmatprep.subr.bf16.mxu1 %v1131_v17 }
 0x31e   :  { %918 = vmatpush1.bf16.msra.mxu1 %v917_v38 }
 0x31f   :  { %919 = vmatprep.subr.bf16.mxu1 %v1131_v17 }
 0x322   :  { %921 = vmatpush1.bf16.msra.mxu1 %v920_v42 }
 0x323   :  { %922 = vmatprep.subr.bf16.mxu1 %v1131_v17 }
 0x326   :  { %924 = vmatpush1.bf16.msra.mxu1 %v923_v45 }
 0x327   :  { %925 = vmatprep.subr.bf16.mxu1 %v1131_v17 }
 0x32a   :  { %927 = vmatpush1.bf16.msra.mxu1 %v926_v54 }
 0x32b   :  { %928 = vmatprep.subr.bf16.mxu1 %v1131_v17 }
 0x32e   :  { %930 = vmatpush1.bf16.msra.mxu1 %v929_v57 }
 0x3d0   :  { %v496_v62 = vpop.f32.mrb[0].mxu1 }
 0x3d1   :  { %v572_v0 = vmul.f32 %v496_v62, %v391_v61  ;;  %v498_v2 = vpop.f32.mrb[1].mxu1 }
 0x3d2   :  { %v573_v3 = vmul.f32 %v498_v2, %v392_v1 }
 0x3d4   :  { %v567_v6 = vpop.f32.mrb[2].mxu1  ;;  %699 = vmatprep.mubr.f32.mxu0 %v573_v3 }
 0x3d5   :  { %v574_v7 = vmul.f32 %v567_v6, %v393_v4  ;;  %v569_v8 = vpop.f32.mrb[3].mxu1  ;;  %700 = vmatmul.mubr.f32.vlgmr.msra.gmra.mrb[12].mxu0 %v572_v0 }
 0x3d6   :  { %v575_v28 = vmul.f32 %v569_v8, %v179_v21 }
 0x3d8   :  { %815 = vmatprep.mubr.msk.f32.mxu1 %vm390_vm8, %v575_v28 }
 0x3d9   :  { %770 = vmatmul.mubr.f32.vlgmr.msra.gmra.mrb[4].mxu1 %v574_v7 }
 0x4a8   :  { %v848_v9 = vpop.f32.mrb[12].mxu0 }
 0x4a9   :  { %v849_v10 = vpop.f32.mrb[13].mxu0 }
 0x4aa   :  { %v850_v40 = vadd.f32 %v849_v10, %v848_v9 }
 0x4ac   :  { %v771_v27 = vpop.f32.mrb[4].mxu1 }
 0x4ad   :  { %v772_v12 = vadd.f32 %v850_v40, %v771_v27  ;;  %v773_v13 = vpop.f32.mrb[5].mxu1 }
 0x4af   :  { %775 = vst [vmem:[#allocation11] sm:$0xff] %v772_v12 }
 0x4b0   :  { %1098 = shalt.err (!%p1095_p2)
}
 0x4b1   :  { %s1099_s1 = scalar_lea.hbm %s1350_s7, 128 }
 0x4b2   :  { %p1100_p3 = scmp.ne.s32.totalorder %s1350_s7, %s1099_s1  ;;  %p1103_p4 = scmp.lt.u32.totalorder %s1099_s1, %s1350_s7 }
 0x4b4   :  { %p1105_p5 = pnand %p1103_p4, %p1100_p3 }
 0x4b6   :  { %1108 = shalt.err (!%p1105_p5)
}
 0x4b7   :  { %785 = dma.vmem_to_hbm [thread:$0]  %s783_s4, 128, %s1350_s7, [#allocation4]  }
 0x4b8   :  { %1115 = dma.done.wait [#allocation4], 128  }
 0x4b9   :  { %1116 = vsyncadd [#allocation4], 4294967168 }
 0x4ba   :  { %789 = vsyncpa [#allocation3], 1 }
 0x4bb   :  { %790 = vsyncpa [#allocation6], 1 }
 0x4bc   :  { %791 = vsyncpa [#allocation9], 1 }
 0x4bd   :  { %792 = vsyncpa [#allocation4], 1 }

</bundles_post_ra>
